<compile_context>
chip_gen: v5e
topology: v5e:2x2
jax: 0.10.0
libtpu: 0.0.40
codegen_flags: <defaults>
</compile_context>

<pallas_src>
import jax
import jax.numpy as jnp
from jax.experimental import pallas as pl
from jax.experimental.pallas import tpu as pltpu


# ----------------------------------------------------------------------------
# Pallas kernel: pure Linear -> ReLU -> Linear -> ReLU -> Linear (BN folded).
# ----------------------------------------------------------------------------
def _mlp_kernel(x_ref, w1_ref, b1_ref, w2_ref, b2_ref, w3_ref, b3_ref, out_ref):
    h = jnp.dot(x_ref[...], w1_ref[...], preferred_element_type=jnp.float32)
    h = jnp.maximum(h + b1_ref[...], 0.0)

    h = jnp.dot(h, w2_ref[...], preferred_element_type=jnp.float32)
    h = jnp.maximum(h + b2_ref[...], 0.0)

    out_ref[...] = (
        jnp.dot(h, w3_ref[...], preferred_element_type=jnp.float32) + b3_ref[...]
    )


def _round_up(n, m):
    return ((n + m - 1) // m) * m


def mlp_forward(x, params, *, tb=128):
    """Run the Pallas kernel on pre-concatenated [x_emb, x_cont_raw].

    params = [w1, b1, w2, b2, w3, b3] with all BN affines already folded in.
    """
    w1, b1, w2, b2, w3, b3 = params
    B, n_in = x.shape
    H1 = w1.shape[1]
    H2 = w2.shape[1]
    out_size = w3.shape[1]

    # Batch tile: multiple of 8 (f32 sublane), capped at `tb`.
    tb = min(tb, _round_up(B, 8))
    b_pad = _round_up(B, tb)
    if b_pad != B:
        x = jnp.pad(x, ((0, b_pad - B), (0, 0)))
    grid = (b_pad // tb,)

    flops = 2 * b_pad * (n_in * H1 + H1 * H2 + H2 * out_size)
    bytes_accessed = 4 * (
        b_pad * (n_in + out_size)
        + w1.size + b1.size + w2.size + b2.size + w3.size + b3.size
    )

    out = pl.pallas_call(
        _mlp_kernel,
        out_shape=jax.ShapeDtypeStruct((b_pad, out_size), jnp.float32),
        grid=grid,
        in_specs=[
            pl.BlockSpec((tb, n_in), lambda i: (i, 0)),      # activations: tiled
            pl.BlockSpec(w1.shape, lambda i: (0, 0)),        # weights: VMEM-resident
            pl.BlockSpec(b1.shape, lambda i: (0, 0)),
            pl.BlockSpec(w2.shape, lambda i: (0, 0)),
            pl.BlockSpec(b2.shape, lambda i: (0, 0)),
            pl.BlockSpec(w3.shape, lambda i: (0, 0)),
            pl.BlockSpec(b3.shape, lambda i: (0, 0)),
        ],
        out_specs=pl.BlockSpec((tb, out_size), lambda i: (i, 0)),
        compiler_params=pltpu.CompilerParams(
            dimension_semantics=("parallel",)),
        cost_estimate=pl.CostEstimate(
            flops=flops, transcendentals=0, bytes_accessed=bytes_accessed),
    )(x, w1, b1, w2, b2, w3, b3)
    return out[:B]


# ----------------------------------------------------------------------------
# Parameter setup (deterministic, synthetic weights) + exact BN folding.
# ----------------------------------------------------------------------------
def init_params(key, embedding_sizes, n_continue, hidden_layers, output_size):
    assert len(hidden_layers) == 2, "kernel is specialised to 2 hidden layers"
    n_embs = sum(nf for _, nf in embedding_sizes)
    eps = 1e-5

    keys = list(jax.random.split(key, 24))
    k = iter(keys)

    def lin(kk, n_in, n_out):
        # Uniform(-1/sqrt(n_in), 1/sqrt(n_in)), like nn.Linear default init.
        bound = 1.0 / jnp.sqrt(jnp.float32(n_in))
        w = jax.random.uniform(kk, (n_in, n_out), jnp.float32, -bound, bound)
        b = jax.random.uniform(jax.random.fold_in(kk, 1), (1, n_out),
                               jnp.float32, -bound, bound)
        return w, b

    def bn(kk, n):
        # Non-trivial eval-mode BN stats so the folding math is exercised.
        gamma = 1.0 + 0.1 * jax.random.normal(jax.random.fold_in(kk, 0), (1, n))
        beta = 0.1 * jax.random.normal(jax.random.fold_in(kk, 1), (1, n))
        mean = 0.1 * jax.random.normal(jax.random.fold_in(kk, 2), (1, n))
        var = jnp.abs(1.0 + 0.1 * jax.random.normal(jax.random.fold_in(kk, 3), (1, n)))
        scale = gamma / jnp.sqrt(var + eps)
        shift = beta - mean * scale
        return scale.astype(jnp.float32), shift.astype(jnp.float32)

    # Embedding tables (N(0,1), like nn.Embedding default).
    emb_tables = [
        jax.random.normal(next(k), (ni, nf), jnp.float32)
        for ni, nf in embedding_sizes
    ]

    cont_scale, cont_shift = bn(next(k), n_continue)   # bn_cont

    H1, H2 = hidden_layers
    w1, b1 = lin(next(k), n_embs + n_continue, H1)
    s1, t1 = bn(next(k), H1)                           # BatchNorm1d(H1)
    w2, b2 = lin(next(k), H1, H2)
    s2, t2 = bn(next(k), H2)                           # BatchNorm1d(H2)
    w3, b3 = lin(next(k), H2, output_size)

    raw = (cont_scale, cont_shift, w1, b1, s1, t1, w2, b2, s2, t2, w3, b3)
    return emb_tables, raw, n_embs


def fold_params(raw, n_embs):
    """Fold all eval-mode BN affines into the adjacent Linear layers (exact)."""
    (cs, ct, w1, b1, s1, t1, w2, b2, s2, t2, w3, b3) = raw

    # bn_cont into Linear1 (continuous rows):  (x*cs + ct) @ W = x @ (cs^T * W) + ct @ W
    w1_cont = w1[n_embs:]
    w1f = jnp.concatenate([w1[:n_embs], cs.reshape(-1, 1) * w1_cont], axis=0)
    b1f = b1 + ct @ w1_cont

    # BN(H1) into Linear2:  (h*s1 + t1) @ W2 = h @ (s1^T * W2) + t1 @ W2
    w2f = s1.reshape(-1, 1) * w2
    b2f = b2 + t1 @ w2

    # BN(H2) into Linear3.
    w3f = s2.reshape(-1, 1) * w3
    b3f = b3 + t2 @ w3

    return [w1f, b1f, w2f, b2f, w3f, b3f]


def embed_and_concat(emb_tables, x_cat):
    # Glue: embedding gathers + concat along feature axis (matches PyTorch loop).
    parts = [tbl[x_cat[:, i]] for i, tbl in enumerate(emb_tables)]
    return jnp.concatenate(parts, axis=1)


# ----------------------------------------------------------------------------
# Pure-JAX reference (un-folded params) for correctness checking.
# ----------------------------------------------------------------------------
def reference_forward(x_emb, x_cont, raw):
    (cs, ct, w1, b1, s1, t1, w2, b2, s2, t2, w3, b3) = raw
    xc = x_cont * cs + ct                               # bn_cont (eval)
    x = jnp.concatenate([x_emb, xc], axis=1)
    h = jnp.maximum(x @ w1 + b1, 0.0) * s1 + t1         # Linear -> ReLU -> BN
    h = jnp.maximum(h @ w2 + b2, 0.0) * s2 + t2
    return h @ w3 + b3


if __name__ == "__main__":
    # Small config consistent with the taxi-fare tabular model.
    embedding_sizes = [(24, 12), (2, 1), (7, 4)]   # hour, am/pm, weekday
    n_continue = 6
    hidden_layers = [32, 16]
    output_size = 1
    batch = 8

    key = jax.random.PRNGKey(0)
    k_param, k_cat, k_cont = jax.random.split(key, 3)

    emb_tables, raw_params, n_embs = init_params(
        k_param, embedding_sizes, n_continue, hidden_layers, output_size)
    kernel_params = fold_params(raw_params, n_embs)

    # Inputs: categorical indices + continuous features.
    x_cat = jnp.stack(
        [jax.random.randint(jax.random.fold_in(k_cat, i), (batch,), 0, ni)
         for i, (ni, _) in enumerate(embedding_sizes)],
        axis=1,
    ).astype(jnp.int32)                                   # (batch, n_cat)
    x_cont = jax.random.normal(k_cont, (batch, n_continue), jnp.float32)

    x_emb = embed_and_concat(emb_tables, x_cat)           # (batch, n_embs)
    x_in = jnp.concatenate([x_emb, x_cont], axis=1)       # (batch, n_embs + n_cont)

    out = mlp_forward(x_in, kernel_params)
    out = jax.block_until_ready(out)

    ref = reference_forward(x_emb, x_cont, raw_params)
    assert out.shape == (batch, output_size)
    assert jnp.allclose(out, ref, atol=1e-4, rtol=1e-4), "mismatch vs reference"

    print("KERNEL_OK")
</pallas_src>

<mosaic_0001>
module attributes {stable_mosaic.version = 11 : i64} {
  func.func @_mlp_kernel(%arg0: i32, %arg1: memref<8x23xf32, #tpu.memory_space<vmem>>, %arg2: memref<23x32xf32, #tpu.memory_space<vmem>>, %arg3: memref<1x32xf32, #tpu.memory_space<vmem>>, %arg4: memref<32x16xf32, #tpu.memory_space<vmem>>, %arg5: memref<1x16xf32, #tpu.memory_space<vmem>>, %arg6: memref<16x1xf32, #tpu.memory_space<vmem>>, %arg7: memref<1x1xf32, #tpu.memory_space<vmem>>, %arg8: memref<8x1xf32, #tpu.memory_space<vmem>>) attributes {dimension_semantics = [#tpu.dimension_semantics<parallel>], iteration_bounds = array<i64: 1>, scalar_prefetch = 0 : i64, scratch_operands = 0 : i64, tpu.core_type = #tpu.core_type<tc>, window_params = [{transform_indices = @transform_0, window_bounds = array<i64: 8, 23>}, {pipeline_mode = #tpu.pipeline_mode<synchronous>, transform_indices = @transform_1, window_bounds = array<i64: 23, 32>}, {pipeline_mode = #tpu.pipeline_mode<synchronous>, transform_indices = @transform_2, window_bounds = array<i64: 1, 32>}, {pipeline_mode = #tpu.pipeline_mode<synchronous>, transform_indices = @transform_3, window_bounds = array<i64: 32, 16>}, {pipeline_mode = #tpu.pipeline_mode<synchronous>, transform_indices = @transform_4, window_bounds = array<i64: 1, 16>}, {pipeline_mode = #tpu.pipeline_mode<synchronous>, transform_indices = @transform_5, window_bounds = array<i64: 16, 1>}, {pipeline_mode = #tpu.pipeline_mode<synchronous>, transform_indices = @transform_6, window_bounds = array<i64: 1, 1>}, {transform_indices = @transform_7, window_bounds = array<i64: 8, 1>}]} {
    %c0 = arith.constant 0 : index
    %c0_0 = arith.constant 0 : index
    %0 = vector.load %arg1[%c0, %c0_0] : memref<8x23xf32, #tpu.memory_space<vmem>>, vector<8x23xf32>
    %c0_1 = arith.constant 0 : index
    %c0_2 = arith.constant 0 : index
    %1 = vector.load %arg2[%c0_1, %c0_2] : memref<23x32xf32, #tpu.memory_space<vmem>>, vector<23x32xf32>
    %cst = arith.constant dense<0.000000e+00> : vector<8x32xf32>
    %2 = tpu.matmul %0, %1, %cst {dimension_numbers = #tpu.dot_dimension_numbers<[1], [0], [0], [1], [0, 0, 1, 1], [], []>} : vector<8x23xf32>, vector<23x32xf32>, vector<8x32xf32> -> vector<8x32xf32>
    %c0_3 = arith.constant 0 : index
    %c0_4 = arith.constant 0 : index
    %3 = vector.load %arg3[%c0_3, %c0_4] : memref<1x32xf32, #tpu.memory_space<vmem>>, vector<1x32xf32>
    %4 = vector.broadcast %3 : vector<1x32xf32> to vector<8x32xf32>
    %5 = arith.addf %2, %4 : vector<8x32xf32>
    %cst_5 = arith.constant 0.000000e+00 : f32
    %6 = vector.broadcast %cst_5 : f32 to vector<8x32xf32>
    %7 = arith.maximumf %5, %6 : vector<8x32xf32>
    %c0_6 = arith.constant 0 : index
    %c0_7 = arith.constant 0 : index
    %8 = vector.load %arg4[%c0_6, %c0_7] : memref<32x16xf32, #tpu.memory_space<vmem>>, vector<32x16xf32>
    %cst_8 = arith.constant dense<0.000000e+00> : vector<8x16xf32>
    %9 = tpu.matmul %7, %8, %cst_8 {dimension_numbers = #tpu.dot_dimension_numbers<[1], [0], [0], [1], [0, 0, 1, 1], [], []>} : vector<8x32xf32>, vector<32x16xf32>, vector<8x16xf32> -> vector<8x16xf32>
    %c0_9 = arith.constant 0 : index
    %c0_10 = arith.constant 0 : index
    %10 = vector.load %arg5[%c0_9, %c0_10] : memref<1x16xf32, #tpu.memory_space<vmem>>, vector<1x16xf32>
    %11 = vector.broadcast %10 : vector<1x16xf32> to vector<8x16xf32>
    %12 = arith.addf %9, %11 : vector<8x16xf32>
    %cst_11 = arith.constant 0.000000e+00 : f32
    %13 = vector.broadcast %cst_11 : f32 to vector<8x16xf32>
    %14 = arith.maximumf %12, %13 : vector<8x16xf32>
    %c0_12 = arith.constant 0 : index
    %c0_13 = arith.constant 0 : index
    %15 = vector.load %arg6[%c0_12, %c0_13] : memref<16x1xf32, #tpu.memory_space<vmem>>, vector<16x1xf32>
    %cst_14 = arith.constant dense<0.000000e+00> : vector<8x1xf32>
    %16 = tpu.matmul %14, %15, %cst_14 {dimension_numbers = #tpu.dot_dimension_numbers<[1], [0], [0], [1], [0, 0, 1, 1], [], []>} : vector<8x16xf32>, vector<16x1xf32>, vector<8x1xf32> -> vector<8x1xf32>
    %c0_15 = arith.constant 0 : index
    %c0_16 = arith.constant 0 : index
    %17 = vector.load %arg7[%c0_15, %c0_16] : memref<1x1xf32, #tpu.memory_space<vmem>>, vector<1x1xf32>
    %18 = vector.broadcast %17 : vector<1x1xf32> to vector<8x1xf32>
    %19 = arith.addf %16, %18 : vector<8x1xf32>
    %c0_17 = arith.constant 0 : index
    %c0_18 = arith.constant 0 : index
    %20 = vector.load %arg8[%c0_17, %c0_18] : memref<8x1xf32, #tpu.memory_space<vmem>>, vector<8x1xf32>
    tpu.vector_store %arg8[%c0_17, %c0_18], %19 {strides = array<i32>} : memref<8x1xf32, #tpu.memory_space<vmem>>, vector<8x1xf32>,
    return
  }
  func.func @transform_0(%arg0: i32) -> (i32, i32) {
    %c0_i32 = arith.constant 0 : i32
    %c0_i32_0 = arith.constant 0 : i32
    return %arg0, %c0_i32 : i32, i32
  }
  func.func @transform_1(%arg0: i32) -> (i32, i32) {
    %c0_i32 = arith.constant 0 : i32
    %c0_i32_0 = arith.constant 0 : i32
    %c0_i32_1 = arith.constant 0 : i32
    return %c0_i32, %c0_i32_0 : i32, i32
  }
  func.func @transform_2(%arg0: i32) -> (i32, i32) {
    %c0_i32 = arith.constant 0 : i32
    %c0_i32_0 = arith.constant 0 : i32
    %c0_i32_1 = arith.constant 0 : i32
    return %c0_i32, %c0_i32_0 : i32, i32
  }
  func.func @transform_3(%arg0: i32) -> (i32, i32) {
    %c0_i32 = arith.constant 0 : i32
    %c0_i32_0 = arith.constant 0 : i32
    %c0_i32_1 = arith.constant 0 : i32
    return %c0_i32, %c0_i32_0 : i32, i32
  }
  func.func @transform_4(%arg0: i32) -> (i32, i32) {
    %c0_i32 = arith.constant 0 : i32
    %c0_i32_0 = arith.constant 0 : i32
    %c0_i32_1 = arith.constant 0 : i32
    return %c0_i32, %c0_i32_0 : i32, i32
  }
  func.func @transform_5(%arg0: i32) -> (i32, i32) {
    %c0_i32 = arith.constant 0 : i32
    %c0_i32_0 = arith.constant 0 : i32
    %c0_i32_1 = arith.constant 0 : i32
    return %c0_i32, %c0_i32_0 : i32, i32
  }
  func.func @transform_6(%arg0: i32) -> (i32, i32) {
    %c0_i32 = arith.constant 0 : i32
    %c0_i32_0 = arith.constant 0 : i32
    %c0_i32_1 = arith.constant 0 : i32
    return %c0_i32, %c0_i32_0 : i32, i32
  }
  func.func @transform_7(%arg0: i32) -> (i32, i32) {
    %c0_i32 = arith.constant 0 : i32
    %c0_i32_0 = arith.constant 0 : i32
    return %arg0, %c0_i32 : i32, i32
  }
}

</mosaic_0001>

<bundles_post_ra>
// kernel: tpu_custom_call.1
= control target key start
LH: loop header
LB: loop body
LE: loop exit
PB: predicated region body
PF: predicated region fallthrough
CT: control target
= control target key end

     0   :  { %vm40_vm0 = vcmask 1046528   ;;  %vm36_vm1 = vcmask 187392   ;;  %vm73_vm2 = vcmask 261120   ;;  %vm104_vm3 = vcmask 130048   ;;  %s223_s1 = inlined_call_operand.vmem [shape: f32[23,32], index: 1, kind: input, shape index: {}]   ;;  %s224_s3 = inlined_call_operand.vmem [shape: f32[32,16], index: 3, kind: input, shape index: {}]   ;;  %s225_s0 = inlined_call_operand.vmem [shape: f32[8,23], index: 0, kind: input, shape index: {}]   ;;  %s226_s2 = inlined_call_operand.vmem [shape: f32[1,32], index: 2, kind: input, shape index: {}]   ;;  %s227_s4 = inlined_call_operand.vmem [shape: f32[1,16], index: 4, kind: input, shape index: {}]   ;;  %s228_s5 = inlined_call_operand.vmem [shape: f32[16,1], index: 5, kind: input, shape index: {}]   ;;  %s229_s6 = inlined_call_operand.<no memory space> [shape: f32[1,1], index: 6, kind: input, shape index: {}]   ;;  %s230_s7 = inlined_call_operand.vmem [shape: f32[8,1], index: 7, kind: output, shape index: {}]  }
   0x1   :  { %v31_v0 = vld [vmem:[%s223_s1 + $0x10] sm:$0x7f]  ;;  %v30_v1 = vld [vmem:[%s223_s1 + $0x8] sm:$0xff]  ;;  %v68_v2 = vld [vmem:[%s224_s3 + $0x18] sm:$0xff]  ;;  %v12_v14 = vstv %s229_s6  ;;  %vm128_vm4 = vcmask 7168  }
   0x2   :  { %134 = vmatpush.msk.msra.mxu0 %vm40_vm0, %v31_v0  ;;  %v29_v3 = vld [vmem:[%s223_s1] sm:$0xff]  ;;  %89 = vmatpush.msra.mxu1 %v68_v2  ;;  %v67_v5 = vld [vmem:[%s224_s3 + $0x10] sm:$0xff]  ;;  %v66_v6 = vld [vmem:[%s224_s3 + $0x8] sm:$0xff]  ;;  %13 = vst [vmem:[#allocation2] sm:$0x1] %v12_v14 }
   0x3   :  { %v28_v4 = vld [vmem:[%s225_s0] sm:$0xff]  ;;  %v99_v12 = vld [vmem:[%s228_s5 + $0x8] sm:$0xff] }
   0x4   :  { %58 = vmatpush.msra.mxu0 %v30_v1  ;;  %90 = vmatpush.msra.mxu1 %v67_v5  ;;  %v65_v7 = vld [vmem:[%s224_s3] sm:$0xff] }
   0x5   :  { %v138_v8 = vld [vmem:[%s226_s2] ss:$0 sm:$0xff]  ;;  %122 = vmatpush.msra.mxu2 %v99_v12 }
   0x6   :  { %59 = vmatpush.msra.mxu0 %v29_v3  ;;  %91 = vmatpush.msra.mxu1 %v66_v6  ;;  %v98_v13 = vld [vmem:[%s228_s5] sm:$0xff] }
   0x7   :  { %135 = vmatmul.msk.f32.vlgmr.msra.gmra.mxu0 %vm36_vm1, %v28_v4  ;;  %123 = vmatpush.msra.mxu2 %v98_v13  ;;  %v139_v15 = vld [vmem:[%s227_s4] ss:$0 sm:$0xff] }
   0x8   :  { %92 = vmatpush.msra.mxu1 %v65_v7 }
   0x9   :  { %v140_v19 = vld [vmem:[#allocation2] ss:$0 sm:$0xff] }
  0x84   :  { %v61_v9 = vpop.f32.mrf.mxu0 }
  0x85   :  { %v62_v10 = vadd.f32 %v138_v8, %v61_v9 }
  0x87   :  { %v64_v11 = vmax.f32 %v62_v10, 0.0 }
  0x89   :  { %136 = vmatmul.msk.f32.vlgmr.msra.gmra.mxu1 %vm73_vm2, %v64_v11 }
 0x106   :  { %v94_v16 = vpop.f32.mrf.mxu1 }
 0x107   :  { %v95_v17 = vadd.f32 %v139_v15, %v94_v16 }
 0x109   :  { %v97_v18 = vmax.f32 %v95_v17, 0.0 }
 0x10b   :  { %137 = vmatmul.msk.f32.vlgmr.msra.gmra.mxu2 %vm104_vm3, %v97_v18 }
 0x18e   :  { %v125_v20 = vpop.f32.mrf.mxu2 }
 0x18f   :  { %v126_v21 = vadd.f32 %v140_v19, %v125_v20 }
 0x191   :  { %129 = vst.msk [vmem:[%s230_s7] sm:$0xff] %vm128_vm4, %v126_v21 }

</bundles_post_ra>
